<compile_context>
chip_gen: v6e
topology: v6e:2x2x1
jax: 0.10.0
libtpu: 0.0.40
codegen_flags: <defaults>
</compile_context>

<pallas_src>
import functools
import math

import jax
import jax.numpy as jnp
from jax.experimental import pallas as pl
from jax.experimental.pallas import tpu as pltpu


def _round_up(x, m):
    return ((x + m - 1) // m) * m


# ----------------------------------------------------------------------------
# Kernel 1: fused linear projection  out = x @ W + b
# ----------------------------------------------------------------------------
def _linear_kernel(x_ref, w_ref, b_ref, o_ref):
    o_ref[...] = (
        jnp.dot(x_ref[...], w_ref[...], preferred_element_type=jnp.float32)
        + b_ref[...]
    ).astype(o_ref.dtype)


def linear(x, w, b, *, tm=256):
    """x: [M, K] @ w: [K, N] + b: [N] -> [M, N] float32.

    Rows are tiled at up to `tm` (clamped / padded to a multiple of 8); the
    output lane dim is zero-padded to a multiple of 128 so stores are
    unmasked lane-dense; the weight / bias blocks use a constant index_map so
    they stay resident in VMEM across the row grid.
    """
    M, K = x.shape
    _, N = w.shape
    tm = min(tm, _round_up(M, 8))
    M_pad = _round_up(M, tm)
    N_pad = _round_up(N, 128)
    if M_pad != M:
        x = jnp.pad(x, ((0, M_pad - M), (0, 0)))
    if N_pad != N:
        w = jnp.pad(w, ((0, 0), (0, N_pad - N)))
        b = jnp.pad(b, (0, N_pad - N))

    # double-buffered x/out tiles + resident weight/bias, with headroom
    need = 2 * (tm * K + tm * N_pad) * 4 + (K * N_pad + N_pad) * 4
    vmem_limit = int(min(48 * 2**20, max(16 * 2**20, 2 * need)))

    out = pl.pallas_call(
        _linear_kernel,
        out_shape=jax.ShapeDtypeStruct((M_pad, N_pad), jnp.float32),
        grid_spec=pltpu.PrefetchScalarGridSpec(
            num_scalar_prefetch=0,
            grid=(M_pad // tm,),
            in_specs=[
                pl.BlockSpec((tm, K), lambda i: (i, 0)),
                pl.BlockSpec((K, N_pad), lambda i: (0, 0)),
                pl.BlockSpec((1, N_pad), lambda i: (0, 0)),
            ],
            out_specs=pl.BlockSpec((tm, N_pad), lambda i: (i, 0)),
        ),
        compiler_params=pltpu.CompilerParams(
            dimension_semantics=("parallel",),
            vmem_limit_bytes=vmem_limit,
        ),
    )(x, w, b.reshape(1, -1))
    return out[:M, :N]


# ----------------------------------------------------------------------------
# Kernel 2: per-edge attention + destination-node aggregation (tiled over E)
#   score = (K_src * Q_dst_scaled) * proj_e               -> e_out (pre-exp)
#   s     = exp(clamp(sum_D score, -5, 5))                -> [tE, H]
#   wV   += adj_block @ (V_src * s_bcast)    (one-hot matmul on the MXU)
#   z    += adj_block @ s
#   h_out = wV * reciprocal(z_bcast + 1e-6)  (finalize on last edge tile)
# ----------------------------------------------------------------------------
def _edge_attn_kernel(dst_ref, k_ref, q_ref, v_ref, pe_ref,
                      e_out_ref, h_out_ref, wv_acc, z_acc,
                      *, num_heads, head_dim, num_nodes):
    i = pl.program_id(0)

    @pl.when(i == 0)
    def _init():
        wv_acc[...] = jnp.zeros_like(wv_acc)
        z_acc[...] = jnp.zeros_like(z_acc)

    HD = num_heads * head_dim
    tE = k_ref.shape[0]

    k = k_ref[...]
    q = q_ref[...]          # 1/sqrt(D) already folded into the Q projection
    v = v_ref[...]
    pe = pe_ref[...]

    # implicit * explicit attention; also the e_out edge feature (pre-exp).
    score_full = k * q * pe                                  # [tE, HD]
    e_out_ref[...] = score_full

    # Block-diagonal 0/1 reduce / expand matrices, built on-chip (cheap VPU).
    head_of_col = jax.lax.broadcasted_iota(jnp.int32, (HD, num_heads), 0) // head_dim
    head_id = jax.lax.broadcasted_iota(jnp.int32, (HD, num_heads), 1)
    R = (head_of_col == head_id).astype(jnp.float32)         # [HD, H] reduce
    head_of_col_t = jax.lax.broadcasted_iota(jnp.int32, (num_heads, HD), 1) // head_dim
    head_id_t = jax.lax.broadcasted_iota(jnp.int32, (num_heads, HD), 0)
    RT = (head_of_col_t == head_id_t).astype(jnp.float32)    # [H, HD] expand

    # per-head sum over D (MXU), clamp, exp
    s = jnp.dot(score_full, R, preferred_element_type=jnp.float32)   # [tE, H]
    score_exp = jnp.exp(jnp.clip(s, -5.0, 5.0))                      # [tE, H]

    # broadcast per-head score back onto HD lanes and weight V
    msg = v * jnp.dot(score_exp, RT, preferred_element_type=jnp.float32)  # [tE, HD]

    # one-hot destination adjacency block built on-chip from dst indices
    # (padded edges carry dst == -1 and therefore scatter nothing).
    dst = dst_ref[...]                                       # [1, tE] int32
    adj = (jax.lax.broadcasted_iota(jnp.int32, (num_nodes, tE), 0) == dst
           ).astype(jnp.float32)                             # [Nd, tE]

    wv_acc[...] += jnp.dot(adj, msg, preferred_element_type=jnp.float32)       # [Nd, HD]
    z_acc[...] += jnp.dot(adj, score_exp, preferred_element_type=jnp.float32)  # [Nd, H]

    @pl.when(i == pl.num_programs(0) - 1)
    def _finalize():
        zb = jnp.dot(z_acc[...], RT, preferred_element_type=jnp.float32) + 1e-6  # [Nd, HD]
        r = pl.reciprocal(zb, approx=True)          # EUP
        r = r * (2.0 - zb * r)                      # Newton refinement (epilogue only)
        r = r * (2.0 - zb * r)
        h_out_ref[...] = wv_acc[...] * r


def edge_attention(dst_adj, K_src, Q_dst, V_src, proj_e, *,
                   num_heads, head_dim, num_nodes, tE):
    E_pad, HD = K_src.shape
    num_tiles = E_pad // tE

    per_step = (tE * 4) + 5 * (tE * HD * 4)                  # dst + 4 inputs + e_out
    resident = num_nodes * HD * 4 * 2 + num_nodes * 128 * 4  # h_out + accumulators
    vmem_limit = int(min(48 * 2**20, max(16 * 2**20, 2 * (2 * per_step + resident))))

    kern = functools.partial(_edge_attn_kernel, num_heads=num_heads,
                             head_dim=head_dim, num_nodes=num_nodes)
    edge_spec = pl.BlockSpec((tE, HD), lambda i: (i, 0))

    # TODO(synk): for graphs where [num_nodes, HD] does not fit in VMEM, the
    # node axis should also be tiled (and made a 'parallel' axis for v7x's two
    # TensorCores); the current kernel only tiles/pipelines the edge axis.
    return pl.pallas_call(
        kern,
        out_shape=(jax.ShapeDtypeStruct((E_pad, HD), jnp.float32),
                   jax.ShapeDtypeStruct((num_nodes, HD), jnp.float32)),
        grid_spec=pltpu.PrefetchScalarGridSpec(
            num_scalar_prefetch=0,
            grid=(num_tiles,),
            in_specs=[pl.BlockSpec((1, tE), lambda i: (0, i)),
                      edge_spec, edge_spec, edge_spec, edge_spec],
            out_specs=(edge_spec,
                       pl.BlockSpec((num_nodes, HD), lambda i: (0, 0))),
            scratch_shapes=[pltpu.VMEM((num_nodes, HD), jnp.float32),
                            pltpu.VMEM((num_nodes, num_heads), jnp.float32)],
        ),
        compiler_params=pltpu.CompilerParams(
            dimension_semantics=("arbitrary",),
            vmem_limit_bytes=vmem_limit,
        ),
    )(dst_adj, K_src, Q_dst, V_src, proj_e)


# ----------------------------------------------------------------------------
# Full forward pass (glue in plain JAX: weight fusion / gathers / padding)
# ----------------------------------------------------------------------------
def multi_head_attention_forward(params, src_idx, dst_idx, h, e,
                                 *, num_heads, out_dim, num_nodes):
    HD = num_heads * out_dim
    inv_scale = 1.0 / math.sqrt(out_dim)

    # Fused Q/K/V projection: one kernel launch, 1/sqrt(D) folded into Wq/bq.
    Wqkv = jnp.concatenate(
        [params["Wq"] * inv_scale, params["Wk"], params["Wv"]], axis=1)
    bqkv = jnp.concatenate(
        [params["bq"] * inv_scale, params["bk"], params["bv"]])
    qkv = linear(h, Wqkv, bqkv)                    # [N, 3*HD]
    Q_h = qkv[:, :HD]
    K_h = qkv[:, HD:2 * HD]
    V_h = qkv[:, 2 * HD:]

    proj_e = linear(e, params["We"], params["be"])  # [E, HD]

    # pad edge count to a multiple of the edge tile
    E = e.shape[0]
    tE = min(512, _round_up(E, 128))
    E_pad = _round_up(E, tE)
    pad = E_pad - E

    src_g = jnp.pad(src_idx, (0, pad))                                   # gather idx
    dst_g = jnp.pad(dst_idx, (0, pad))
    dst_adj = jnp.pad(dst_idx, (0, pad), constant_values=-1).astype(jnp.int32)

    # per-edge gathers (graph message-passing glue)
    K_src = K_h[src_g]
    Q_dst = Q_h[dst_g]
    V_src = V_h[src_g]
    proj_e_p = jnp.pad(proj_e, ((0, pad), (0, 0)))

    e_out_flat, h_out_flat = edge_attention(
        dst_adj.reshape(1, E_pad), K_src, Q_dst, V_src, proj_e_p,
        num_heads=num_heads, head_dim=out_dim, num_nodes=num_nodes, tE=tE)

    h_out = h_out_flat.reshape(num_nodes, num_heads, out_dim)
    e_out = e_out_flat[:E].reshape(E, num_heads, out_dim)
    return h_out, e_out


# ----------------------------------------------------------------------------
# Pure-JAX reference (mirrors the DGL message-passing semantics exactly)
# ----------------------------------------------------------------------------
def reference_forward(params, src_idx, dst_idx, h, e,
                      *, num_heads, out_dim, num_nodes):
    def lin(x, W, b):
        return x @ W + b

    Q_h = lin(h, params["Wq"], params["bq"]).reshape(-1, num_heads, out_dim)
    K_h = lin(h, params["Wk"], params["bk"]).reshape(-1, num_heads, out_dim)
    V_h = lin(h, params["Wv"], params["bv"]).reshape(-1, num_heads, out_dim)
    proj_e = lin(e, params["We"], params["be"]).reshape(-1, num_heads, out_dim)

    score = K_h[src_idx] * Q_h[dst_idx]                    # src_dot_dst
    score = score / math.sqrt(out_dim)                     # scaling
    score = score * proj_e                                 # imp_exp_attn
    e_out = score                                          # out_edge_features
    s = jnp.exp(jnp.clip(score.sum(-1, keepdims=True), -5.0, 5.0))   # exp
    wV = jax.ops.segment_sum(V_h[src_idx] * s, dst_idx, num_segments=num_nodes)
    z = jax.ops.segment_sum(s, dst_idx, num_segments=num_nodes)
    h_out = wV / (z + 1e-6)
    return h_out, e_out


if __name__ == "__main__":
    # small, deterministic setup
    in_dim, out_dim, num_heads = 32, 16, 4
    N, E = 16, 48
    HD = out_dim * num_heads

    key = jax.random.PRNGKey(0)
    ks = jax.random.split(key, 12)
    params = {
        "Wq": jax.random.normal(ks[0], (in_dim, HD), jnp.float32) * 0.1,
        "bq": jax.random.normal(ks[1], (HD,), jnp.float32) * 0.1,
        "Wk": jax.random.normal(ks[2], (in_dim, HD), jnp.float32) * 0.1,
        "bk": jax.random.normal(ks[3], (HD,), jnp.float32) * 0.1,
        "Wv": jax.random.normal(ks[4], (in_dim, HD), jnp.float32) * 0.1,
        "bv": jax.random.normal(ks[5], (HD,), jnp.float32) * 0.1,
        "We": jax.random.normal(ks[6], (in_dim, HD), jnp.float32) * 0.1,
        "be": jax.random.normal(ks[7], (HD,), jnp.float32) * 0.1,
    }
    h = jax.random.normal(ks[8], (N, in_dim), jnp.float32)
    e = jax.random.normal(ks[9], (E, in_dim), jnp.float32)
    src_idx = jax.random.randint(ks[10], (E,), 0, N)
    dst_idx = jax.random.randint(ks[11], (E,), 0, N)

    h_out, e_out = multi_head_attention_forward(
        params, src_idx, dst_idx, h, e,
        num_heads=num_heads, out_dim=out_dim, num_nodes=N)
    jax.block_until_ready((h_out, e_out))

    h_ref, e_ref = reference_forward(
        params, src_idx, dst_idx, h, e,
        num_heads=num_heads, out_dim=out_dim, num_nodes=N)

    assert h_out.shape == (N, num_heads, out_dim)
    assert e_out.shape == (E, num_heads, out_dim)
    assert jnp.allclose(e_out, e_ref, atol=1e-4, rtol=1e-4)
    assert jnp.allclose(h_out, h_ref, atol=1e-3, rtol=1e-3)

    print("KERNEL_OK")
</pallas_src>

<mosaic_0001>
module attributes {stable_mosaic.version = 11 : i64} {
  func.func @_linear_kernel(%arg0: i32, %arg1: memref<16x32xf32, #tpu.memory_space<vmem>>, %arg2: memref<32x256xf32, #tpu.memory_space<vmem>>, %arg3: memref<1x256xf32, #tpu.memory_space<vmem>>, %arg4: memref<16x256xf32, #tpu.memory_space<vmem>>) attributes {dimension_semantics = [#tpu.dimension_semantics<parallel>], iteration_bounds = array<i64: 1>, scalar_prefetch = 0 : i64, scratch_operands = 0 : i64, tpu.core_type = #tpu.core_type<tc>, window_params = [{transform_indices = @transform_0, window_bounds = array<i64: 16, 32>}, {pipeline_mode = #tpu.pipeline_mode<synchronous>, transform_indices = @transform_1, window_bounds = array<i64: 32, 256>}, {pipeline_mode = #tpu.pipeline_mode<synchronous>, transform_indices = @transform_2, window_bounds = array<i64: 1, 256>}, {transform_indices = @transform_3, window_bounds = array<i64: 16, 256>}]} {
    %c0 = arith.constant 0 : index
    %c0_0 = arith.constant 0 : index
    %0 = vector.load %arg1[%c0, %c0_0] : memref<16x32xf32, #tpu.memory_space<vmem>>, vector<16x32xf32>
    %c0_1 = arith.constant 0 : index
    %c0_2 = arith.constant 0 : index
    %1 = vector.load %arg2[%c0_1, %c0_2] : memref<32x256xf32, #tpu.memory_space<vmem>>, vector<32x256xf32>
    %cst = arith.constant dense<0.000000e+00> : vector<16x256xf32>
    %2 = tpu.matmul %0, %1, %cst {dimension_numbers = #tpu.dot_dimension_numbers<[1], [0], [0], [1], [0, 0, 1, 1], [], []>} : vector<16x32xf32>, vector<32x256xf32>, vector<16x256xf32> -> vector<16x256xf32>
    %c0_3 = arith.constant 0 : index
    %c0_4 = arith.constant 0 : index
    %3 = vector.load %arg3[%c0_3, %c0_4] : memref<1x256xf32, #tpu.memory_space<vmem>>, vector<1x256xf32>
    %4 = vector.broadcast %3 : vector<1x256xf32> to vector<16x256xf32>
    %5 = arith.addf %2, %4 : vector<16x256xf32>
    %c0_5 = arith.constant 0 : index
    %c0_6 = arith.constant 0 : index
    %6 = vector.load %arg4[%c0_5, %c0_6] : memref<16x256xf32, #tpu.memory_space<vmem>>, vector<16x256xf32>
    tpu.vector_store %arg4[%c0_5, %c0_6], %5 {strides = array<i32>} : memref<16x256xf32, #tpu.memory_space<vmem>>, vector<16x256xf32>,
    return
  }
  func.func @transform_0(%arg0: i32) -> (i32, i32) {
    %c0_i32 = arith.constant 0 : i32
    %c0_i32_0 = arith.constant 0 : i32
    return %arg0, %c0_i32 : i32, i32
  }
  func.func @transform_1(%arg0: i32) -> (i32, i32) {
    %c0_i32 = arith.constant 0 : i32
    %c0_i32_0 = arith.constant 0 : i32
    %c0_i32_1 = arith.constant 0 : i32
    return %c0_i32, %c0_i32_0 : i32, i32
  }
  func.func @transform_2(%arg0: i32) -> (i32, i32) {
    %c0_i32 = arith.constant 0 : i32
    %c0_i32_0 = arith.constant 0 : i32
    %c0_i32_1 = arith.constant 0 : i32
    return %c0_i32, %c0_i32_0 : i32, i32
  }
  func.func @transform_3(%arg0: i32) -> (i32, i32) {
    %c0_i32 = arith.constant 0 : i32
    %c0_i32_0 = arith.constant 0 : i32
    return %arg0, %c0_i32 : i32, i32
  }
}

</mosaic_0001>

<bundles_post_ra>
// kernel: tpu_custom_call.1
= control target key start
LH: loop header
LB: loop body
LE: loop exit
PB: predicated region body
PF: predicated region fallthrough
CT: control target
= control target key end

     0   :  { %8 = vsyncpa [#allocation3], 0  ;;  %s301_s0 = inlined_call_operand.hbm [shape: f32[16,32], index: 0, kind: input, shape index: {}]   ;;  %s302_s1 = inlined_call_operand.hbm [shape: f32[32,256], index: 1, kind: input, shape index: {}]   ;;  %s303_s2 = inlined_call_operand.vmem [shape: f32[1,256], index: 2, kind: input, shape index: {}]   ;;  %s304_s3 = inlined_call_operand.hbm [shape: f32[16,256], index: 3, kind: output, shape index: {}]  }
   0x1   :  { %9 = vsyncpa [#allocation6], 0 }
   0x2   :  { %10 = vsyncpa [#allocation4], 0  ;;  %s255_s12 = smov [#allocation2]  }
   0x3   :  { %s16_s13 = sshll.u32 %s255_s12, 4  ;;  %s17_s13 = int_to_ptr.vmem [resolvable:$true] %s16_s13 }
   0x4   :  { %s197_s14 = scalar_lea.vmem %s17_s13, 256  ;;  %p202_p1 = scmp.lt.s32.totalorder %s17_s13, %s17_s13 }
   0x5   :  { %p198_p0 = scmp.ne.s32.totalorder %s17_s13, %s197_s14  ;;  %p203_p2 = scmp.lt.s32.totalorder %s197_s14, %s197_s14 }
   0x7   :  { %p204_p3 = por %p203_p2, %p202_p1 }
   0x9   :  { %p205_p4 = pnand %p204_p3, %p198_p0 }
   0xb   :  { %208 = shalt.err (!%p205_p4)
}
   0xc   :  { %s256_s15 = smov 128   ;;  %s257_s16 = smov 8  }
   0xd   :  { %22 = dma.hbm_to_vmem [thread:$0]  %s301_s0, 256, %s17_s13, [#allocation3], %s256_s15, %s256_s15, %s257_s16  }
   0xe   :  { %s258_s19 = smov [#allocation5]  }
   0xf   :  { %s28_s20 = sshll.u32 %s258_s19, 4  ;;  %s29_s20 = int_to_ptr.vmem [resolvable:$true] %s28_s20 }
  0x10   :  { %s217_s21 = scalar_lea.vmem %s29_s20, 1024  ;;  %p222_p6 = scmp.lt.s32.totalorder %s29_s20, %s29_s20 }
  0x11   :  { %p218_p5 = scmp.ne.s32.totalorder %s29_s20, %s217_s21  ;;  %p223_p7 = scmp.lt.s32.totalorder %s217_s21, %s217_s21 }
  0x13   :  { %p224_p8 = por %p223_p7, %p222_p6 }
  0x15   :  { %p225_p9 = pnand %p224_p8, %p218_p5 }
  0x17   :  { %228 = shalt.err (!%p225_p9)
}
  0x18   :  { %s259_s22 = smov 256   ;;  %s260_s23 = smov 16  }
  0x19   :  { %34 = dma.hbm_to_vmem [thread:$0]  %s302_s1, 1024, %s29_s20, [#allocation6], %s259_s22, %s259_s22, %s260_s23  }
  0x1a   :  { %249 = dma.done.wait [#allocation3], 256  }
  0x1b   :  { %250 = vsyncadd [#allocation3], 4294967040 }
  0x1c   :  { %251 = dma.done.wait [#allocation6], 1024  }
  0x1d   :  { %252 = vsyncadd [#allocation6], 4294966272  ;;  %v261_v0 = vmov 0.0   ;;  %v52_v1 = vld [vmem:[#allocation5 + $0x38] sm:$0xff]  ;;  %v51_v2 = vld [vmem:[#allocation5 + $0x30] sm:$0xff]  ;;  %vm65_vm0 = vcmask 261120   ;;  %v55_v11 = vlaneseq }
  0x1e   :  { %136 = vmatprep.mubr.f32.mxu0 %v261_v0  ;;  %142 = vmatprep.mubr.f32.mxu1 %v261_v0  ;;  %v50_v3 = vld [vmem:[#allocation5 + $0x28] sm:$0xff]  ;;  %v49_v4 = vld [vmem:[#allocation5 + $0x20] sm:$0xff]  ;;  %v48_v5 = vld [vmem:[#allocation5 + $0x18] sm:$0xff]  ;;  %s262_s26 = smov [#allocation7]  }
  0x1f   :  { %96 = vmatprep.subr.mxu0 %v52_v1  ;;  %173 = vmatprep.subr.mxu1 %v52_v1  ;;  %v47_v6 = vld [vmem:[#allocation5 + $0x10] sm:$0xff]  ;;  %v46_v7 = vld [vmem:[#allocation5 + $0x8] sm:$0xff]  ;;  %v45_v8 = vld [vmem:[#allocation5] sm:$0xff]  ;;  %v56_v12 = vshrl.u32 %v55_v11, 7  ;;  %s158_s27 = sshll.u32 %s262_s26, 4  ;;  %s159_s27 = int_to_ptr.vmem [resolvable:$true] %s158_s27 }
  0x20   :  { %97 = vmatpush1.msra.mxu0 %v51_v2  ;;  %177 = vmatpush1.msra.mxu1 %v51_v2  ;;  %v43_v9 = vld [vmem:[#allocation2] sm:$0xff]  ;;  %v44_v10 = vld [vmem:[#allocation2 + $0x8] sm:$0xff]  ;;  %s229_s28 = scalar_lea.vmem %s159_s27, 512  ;;  %p234_p11 = scmp.lt.s32.totalorder %s159_s27, %s159_s27 }
  0x21   :  { %98 = vmatprep.subr.mxu0 %v50_v3  ;;  %174 = vmatprep.subr.mxu1 %v50_v3  ;;  %v57_v13 = vsub.s32 0, %v56_v12  ;;  %v53_v14 = vld [vmem:[%s303_s2] sm:$0x3]  ;;  %v61_v15 = vsub.s32 1, %v56_v12  ;;  %p230_p10 = scmp.ne.s32.totalorder %s159_s27, %s229_s28  ;;  %p235_p12 = scmp.lt.s32.totalorder %s229_s28, %s229_s28 }
  0x22   :  { %99 = vmatpush1.msra.mxu0 %v49_v4  ;;  %178 = vmatpush1.msra.mxu1 %v49_v4 }
  0x23   :  { %100 = vmatprep.subr.mxu0 %v48_v5  ;;  %175 = vmatprep.subr.mxu1 %v48_v5  ;;  %v58_v16 = vrot.slane %v53_v14, %v57_v13  ;;  %v62_v17 = vrot.slane %v53_v14, %v61_v15  ;;  %p236_p13 = por %p235_p12, %p234_p11 }
  0x24   :  { %101 = vmatpush1.msra.mxu0 %v47_v6  ;;  %179 = vmatpush1.msra.mxu1 %v47_v6 }
  0x25   :  { %102 = vmatprep.subr.mxu0 %v46_v7  ;;  %176 = vmatprep.subr.mxu1 %v46_v7  ;;  %p237_p0 = pnand %p236_p13, %p230_p10 }
  0x26   :  { %103 = vmatpush1.msra.mxu0 %v45_v8  ;;  %180 = vmatpush1.msra.mxu1 %v45_v8 }
  0x27   :  { %171 = vmatmul.mubr.msk.f32.vlgmr.msra.gmra.mxu0 %vm65_vm0, %v43_v9  ;;  %172 = vmatmul.mubr.msk.f32.vlgmr.msra.gmra.mxu1 %vm65_vm0, %v44_v10 }
  0xe7   :  { %v138_v18 = vpop.f32.mrf.mxu0  ;;  %v144_v19 = vpop.f32.mrf.mxu1 }
  0xe8   :  { %v139_v20 = vadd.f32 %v138_v18, %v58_v16  ;;  %v145_v21 = vadd.f32 %v144_v19, %v58_v16 }
  0xe9   :  { %v140_v22 = vpop.f32.mrf.mxu0  ;;  %v146_v23 = vpop.f32.mrf.mxu1 }
  0xea   :  { %149 = vst [vmem:[#allocation7] sm:$0xff] %v139_v20  ;;  %151 = vst [vmem:[#allocation7 + $0x10] sm:$0xff] %v145_v21  ;;  %v141_v24 = vadd.f32 %v140_v22, %v62_v17  ;;  %v147_v25 = vadd.f32 %v146_v23, %v62_v17 }
  0xec   :  { %150 = vst [vmem:[#allocation7 + $0x8] sm:$0xff] %v141_v24  ;;  %152 = vst [vmem:[#allocation7 + $0x18] sm:$0xff] %v147_v25 }
  0xed   :  { %240 = shalt.err (!%p237_p0)
}
  0xee   :  { %164 = dma.vmem_to_hbm [thread:$0]  %s159_s27, 512, %s304_s3, [#allocation4], %s259_s22, %s259_s22, %s260_s23  }
  0xef   :  { %253 = dma.done.wait [#allocation4], 512  }
  0xf0   :  { %254 = vsyncadd [#allocation4], 4294966784 }
  0xf1   :  { %168 = vsyncpa [#allocation3], 1 }
  0xf2   :  { %169 = vsyncpa [#allocation6], 1 }
  0xf3   :  { %170 = vsyncpa [#allocation4], 1 }

</bundles_post_ra>
